<compile_context>
chip_gen: v7x
topology: tpu7x:2x2x1
jax: 0.10.0
libtpu: 0.0.40
codegen_flags: <defaults>
</compile_context>

<pallas_src>
import functools

import jax
import jax.numpy as jnp
from jax.experimental import pallas as pl
from jax.experimental.pallas import tpu as pltpu

# ---- small, module-consistent sizes ----
OUTPUT_DIM = 4                         # class output_dim
BATCH_SIZE = 2
D_MODEL = 32
WEIGHT_C = 1e-4
CLASS_N = OUTPUT_DIM * BATCH_SIZE      # class_n = output_dim * batch_size

_VMEM = pl.BlockSpec(memory_space=pltpu.MemorySpace.VMEM)


def _self_expression_kernel(n_rows, sort_ref, inv_ref, coef_ref, x_ref, o_ref):
    """Fused: (one-hot sort) -> Coefficient @ X_sorted -> (one-hot un-sort).

    All permutation work is done as matmuls on the MXU; no dynamic sublane
    addressing, no scratch buffers, single full-tile store to o_ref.
    """
    col = jax.lax.broadcasted_iota(jnp.int32, (n_rows, n_rows), dimension=1)
    # P @ X  == X[sort_idx]      (P[k, sort_idx[k]] = 1)
    p = (col == sort_ref[...]).astype(jnp.float32)
    # Q @ ZX == ZX[inv_idx]      (Q[i, inv_idx[i]] = 1)
    q = (col == inv_ref[...]).astype(jnp.float32)

    # Fold both permutations into the (n, n) Coefficient: C_perm = Q @ (C @ P).
    cp = jnp.dot(coef_ref[...], p, preferred_element_type=jnp.float32)
    c_perm = jnp.dot(q, cp, preferred_element_type=jnp.float32)

    # out = C_perm @ X  ==  (C @ X[sort])[inv]
    o_ref[...] = jnp.dot(c_perm, x_ref[...], preferred_element_type=jnp.float32)


def self_expression_forward(coef, x, y):
    """SelfExpressionLayer.forward(X, Y) == class_forward(X, Y)."""
    n, d = x.shape
    # TODO(synk): torch.argsort is not guaranteed stable while jnp.argsort is; with
    # duplicate labels the sort/unsort round trip is still self-consistent.
    sort_idx = jnp.argsort(jnp.reshape(y, (-1,))).astype(jnp.int32)
    inv_idx = jnp.argsort(sort_idx).astype(jnp.int32)
    sort_col = sort_idx.reshape(n, 1)
    inv_col = inv_idx.reshape(n, 1)

    kernel = functools.partial(_self_expression_kernel, n)
    flops = 2 * n * n * d + 2 * (2 * n * n * n)          # main dot + 2 permute dots
    bytes_accessed = 4 * (n * n + 2 * n * d + 2 * n)

    return pl.pallas_call(
        kernel,
        out_shape=jax.ShapeDtypeStruct((n, d), jnp.float32),
        in_specs=[_VMEM, _VMEM, _VMEM, _VMEM],            # sort, inv, Coefficient, X
        out_specs=_VMEM,
        cost_estimate=pl.CostEstimate(flops=flops, transcendentals=0,
                                      bytes_accessed=bytes_accessed),
    )(sort_col, inv_col, coef, x)


forward = jax.jit(self_expression_forward)


def init_coefficient(n, weight_c):
    # SelfExpression Coefficient parameter, DSC-Net style init (weight_c * ones).
    # TODO(synk): SelfExpression source not in the spec snippet; ZX = C @ X assumed.
    return jnp.full((n, n), weight_c, jnp.float32)


def _reference(coef, x, y):
    # Pure-JAX reference of class_forward for the in-script correctness check.
    idx = jnp.argsort(jnp.reshape(y, (-1,)))
    zx = coef @ x[idx]
    return zx[jnp.argsort(idx)]


if __name__ == "__main__":
    key = jax.random.PRNGKey(0)
    k_coef, k_x, k_y = jax.random.split(key, 3)

    # Coefficient: weight_c * ones init plus a small deterministic perturbation
    # (emulating a trained parameter) so the permutation path is numerically
    # exercised rather than being a permutation-invariant no-op.
    coef = init_coefficient(CLASS_N, WEIGHT_C) + \
        1e-2 * jax.random.normal(k_coef, (CLASS_N, CLASS_N), jnp.float32)

    x = jax.random.normal(k_x, (CLASS_N, D_MODEL), jnp.float32)
    # Labels: each of the OUTPUT_DIM classes appears BATCH_SIZE times, shuffled.
    y = jax.random.permutation(
        k_y, jnp.repeat(jnp.arange(OUTPUT_DIM, dtype=jnp.int32), BATCH_SIZE)
    ).reshape(CLASS_N, 1)

    out = forward(coef, x, y)
    jax.block_until_ready(out)

    assert out.shape == (CLASS_N, D_MODEL)
    ref = _reference(coef, x, y)
    assert jnp.allclose(out, ref, rtol=1e-5, atol=1e-5), "mismatch vs JAX reference"
    print("KERNEL_OK")
</pallas_src>

<mosaic_0001>
module attributes {stable_mosaic.version = 11 : i64} {
  func.func @_self_expression_kernel(%arg0: memref<8x1xi32, #tpu.memory_space<vmem>>, %arg1: memref<8x1xi32, #tpu.memory_space<vmem>>, %arg2: memref<8x8xf32, #tpu.memory_space<vmem>>, %arg3: memref<8x32xf32, #tpu.memory_space<vmem>>, %arg4: memref<8x32xf32, #tpu.memory_space<vmem>>) attributes {dimension_semantics = [], scalar_prefetch = 0 : i64, scratch_operands = 0 : i64, tpu.core_type = #tpu.core_type<tc>} {
    %0 = tpu.iota {dimensions = array<i32: 1>} : vector<8x8xi32>
    %c0 = arith.constant 0 : index
    %c0_0 = arith.constant 0 : index
    %1 = vector.load %arg0[%c0, %c0_0] : memref<8x1xi32, #tpu.memory_space<vmem>>, vector<8x1xi32>
    %2 = vector.broadcast %1 : vector<8x1xi32> to vector<8x8xi32>
    %3 = arith.cmpi eq, %0, %2 : vector<8x8xi32>
    %4 = arith.extui %3 : vector<8x8xi1> to vector<8x8xi32>
    %5 = arith.sitofp %4 : vector<8x8xi32> to vector<8x8xf32>
    %c0_1 = arith.constant 0 : index
    %c0_2 = arith.constant 0 : index
    %6 = vector.load %arg1[%c0_1, %c0_2] : memref<8x1xi32, #tpu.memory_space<vmem>>, vector<8x1xi32>
    %7 = vector.broadcast %6 : vector<8x1xi32> to vector<8x8xi32>
    %8 = arith.cmpi eq, %0, %7 : vector<8x8xi32>
    %9 = arith.extui %8 : vector<8x8xi1> to vector<8x8xi32>
    %10 = arith.sitofp %9 : vector<8x8xi32> to vector<8x8xf32>
    %c0_3 = arith.constant 0 : index
    %c0_4 = arith.constant 0 : index
    %11 = vector.load %arg2[%c0_3, %c0_4] : memref<8x8xf32, #tpu.memory_space<vmem>>, vector<8x8xf32>
    %cst = arith.constant dense<0.000000e+00> : vector<8x8xf32>
    %12 = tpu.matmul %11, %5, %cst {dimension_numbers = #tpu.dot_dimension_numbers<[1], [0], [0], [1], [0, 0, 1, 1], [], []>} : vector<8x8xf32>, vector<8x8xf32>, vector<8x8xf32> -> vector<8x8xf32>
    %cst_5 = arith.constant dense<0.000000e+00> : vector<8x8xf32>
    %13 = tpu.matmul %10, %12, %cst_5 {dimension_numbers = #tpu.dot_dimension_numbers<[1], [0], [0], [1], [0, 0, 1, 1], [], []>} : vector<8x8xf32>, vector<8x8xf32>, vector<8x8xf32> -> vector<8x8xf32>
    %c0_6 = arith.constant 0 : index
    %c0_7 = arith.constant 0 : index
    %14 = vector.load %arg3[%c0_6, %c0_7] : memref<8x32xf32, #tpu.memory_space<vmem>>, vector<8x32xf32>
    %cst_8 = arith.constant dense<0.000000e+00> : vector<8x32xf32>
    %15 = tpu.matmul %13, %14, %cst_8 {dimension_numbers = #tpu.dot_dimension_numbers<[1], [0], [0], [1], [0, 0, 1, 1], [], []>} : vector<8x8xf32>, vector<8x32xf32>, vector<8x32xf32> -> vector<8x32xf32>
    %c0_9 = arith.constant 0 : index
    %c0_10 = arith.constant 0 : index
    %16 = vector.load %arg4[%c0_9, %c0_10] : memref<8x32xf32, #tpu.memory_space<vmem>>, vector<8x32xf32>
    tpu.vector_store %arg4[%c0_9, %c0_10], %15 {strides = array<i32>} : memref<8x32xf32, #tpu.memory_space<vmem>>, vector<8x32xf32>,
    return
  }
}

</mosaic_0001>

<bundles_post_ra>
// kernel: self_expression_forward.1
= control target key start
LH: loop header
LB: loop body
LE: loop exit
PB: predicated region body
PF: predicated region fallthrough
CT: control target
= control target key end

     0   :  { %s386_s0 = inlined_call_operand.vmem [shape: s32[8,1], index: 0, kind: input, shape index: {}]   ;;  %s387_s1 = inlined_call_operand.vmem [shape: s32[8,1], index: 1, kind: input, shape index: {}]   ;;  %s388_s2 = inlined_call_operand.vmem [shape: f32[8,8], index: 2, kind: input, shape index: {}]   ;;  %s389_s3 = inlined_call_operand.vmem [shape: f32[8,32], index: 3, kind: input, shape index: {}]   ;;  %s390_s4 = inlined_call_operand.hbm [shape: f32[8,32], index: 4, kind: output, shape index: {}]  }
   0x1   :  { %v20_v0 = vld [vmem:[%s386_s0] sm:$0xff] }
   0x2   :  { %9 = vsyncpa [#allocation3], 0  ;;  %v329_v1 = vmov 0   ;;  %v330_v2 = vmov 0.0   ;;  %v27_v3 = vld [vmem:[%s387_s1] sm:$0xff]  ;;  %vm331_vm0 = vmmov 0   ;;  %v18_v4 = vlaneseq }
   0x3   :  { %304 = vset.pattern.permute.xlu0 %v329_v1  ;;  %284 = vmatprep.subr.mxu0 %v330_v2  ;;  %v34_v7 = vld [vmem:[%s388_s2] sm:$0xff]  ;;  %vm35_vm1 = vcmask 64512   ;;  %v332_v8 = vmov 1.0   ;;  %s333_s2 = smov [#allocation2]   ;;  %vm256_vm4 = vcmask 261120  }
   0x4   :  { %22 = vperm.xlu0 %304, %v20_v0   ;;  %286 = vmatprep.mubr.msk.f32.mxu0 %vm331_vm0, %v330_v2  ;;  %v19_v5 = vand.u32 127, %v18_v4  ;;  %v182_v9 = vld [vmem:[%s389_s3] sm:$0xff]  ;;  %s264_s21 = sshll.u32 %s333_s2, 4  ;;  %s265_s21 = int_to_ptr.vmem [resolvable:$true] %s264_s21 }
   0x5   :  { %289 = vmatprep.subr.mxu1 %v330_v2  ;;  %291 = vmatprep.mubr.msk.f32.mxu1 %vm331_vm0, %v330_v2  ;;  %s305_s3 = scalar_lea.vmem %s265_s21, 128  ;;  %p310_p1 = scmp.lt.s32.totalorder %s265_s21, %s265_s21 }
   0x6   :  { %p306_p0 = scmp.ne.s32.totalorder %s265_s21, %s305_s3  ;;  %p311_p2 = scmp.lt.s32.totalorder %s305_s3, %s305_s3 }
   0x8   :  { %29 = vperm.xlu0 %304, %v27_v3   ;;  %p312_p3 = por %p311_p2, %p310_p1 }
   0xa   :  { %p313_p4 = pnand %p312_p3, %p306_p0 }
  0x83   :  { %v23_v6 = vpop.permute.xlu0 %22 }
  0x84   :  { %vm24_vm2 = vcmp.eq.s32.totalorder %v19_v5, %v23_v6 }
  0x85   :  { %285 = vmatpush3.msk.msra.mxu0 %vm24_vm2, %v332_v8 }
  0x86   :  { %287 = vmatmul.mubr.msk.f32.vlgmr.msra.gmra.mrb[0].mxu0 %vm35_vm1, %v34_v7  ;;  %294 = vmatprep.subr.mxu0 %v330_v2 }
  0x87   :  { %296 = vmatprep.mubr.msk.f32.mxu0 %vm331_vm0, %v330_v2  ;;  %295 = vmatpush3.msra.mxu0 %v182_v9  ;;  %v30_v10 = vpop.permute.xlu0 %29 }
  0x88   :  { %vm31_vm3 = vcmp.eq.s32.totalorder %v19_v5, %v30_v10 }
  0x89   :  { %v273_v12 = vsel %vm31_vm3, 1.0, %v330_v2 }
 0x159   :  { %v105_v11 = vpop.f32.mrb[0].mxu0 }
 0x15a   :  { %v288_v13 = vpop.f32.mrb[1].mxu0  ;;  %290 = vmatpush3.msra.mxu1 %v105_v11 }
 0x15b   :  { %292 = vmatmul.mubr.msk.f32.vlgmr.msra.gmra.mrb[0].mxu1 %vm35_vm1, %v273_v12 }
 0x22e   :  { %v178_v14 = vpop.f32.mrb[0].mxu1 }
 0x22f   :  { %v293_v15 = vpop.f32.mrb[1].mxu1  ;;  %297 = vmatmul.mubr.msk.f32.vlgmr.msra.gmra.mrb[2].mxu0 %vm35_vm1, %v178_v14 }
 0x302   :  { %v252_v16 = vpop.f32.mrb[2].mxu0 }
 0x303   :  { %257 = vst.msk [vmem:[#allocation2] sm:$0xff] %vm256_vm4, %v252_v16  ;;  %v298_v17 = vpop.f32.mrb[3].mxu0 }
 0x304   :  { %316 = shalt.err (!%p313_p4)
}
 0x305   :  { %s317_s24 = scalar_lea.hbm %s390_s4, 128 }
 0x306   :  { %p318_p5 = scmp.ne.s32.totalorder %s390_s4, %s317_s24  ;;  %p321_p6 = scmp.lt.u32.totalorder %s317_s24, %s390_s4 }
 0x308   :  { %p323_p7 = pnand %p321_p6, %p318_p5 }
 0x30a   :  { %326 = shalt.err (!%p323_p7)
}
 0x30b   :  { %267 = dma.vmem_to_hbm [thread:$0]  %s265_s21, 128, %s390_s4, [#allocation3]  }
 0x30c   :  { %327 = dma.done.wait [#allocation3], 128  }
 0x30d   :  { %328 = vsyncadd [#allocation3], 4294967168 }
 0x30e   :  { %271 = vsyncpa [#allocation3], 1 }

</bundles_post_ra>
